<compile_context>
chip_gen: v6e
topology: v6e:2x2x1
jax: 0.10.0
libtpu: 0.0.40
codegen_flags: <defaults>
</compile_context>

<pallas_src>
import jax
import jax.numpy as jnp
from jax.experimental import pallas as pl
from jax.experimental.pallas import tpu as pltpu


def _critic_head_kernel(x_ref, w_ref, b_ref, o_ref):
    # x_ref: (block_b, D) VMEM    w_ref: (8, D) VMEM (row 0 = weight row)
    # b_ref: (1, 1) SMEM          o_ref: (1, block_b) VMEM (lane-dense)
    acc = jax.lax.dot_general(
        w_ref[...], x_ref[...],
        dimension_numbers=(((1,), (1,)), ((), ())),   # w @ x.T -> (8, block_b)
        preferred_element_type=jnp.float32,
    )
    # Row 0 holds the real dot products; add bias from the scalar path.
    o_ref[...] = (acc[0:1, :] + b_ref[0, 0]).astype(o_ref.dtype)


def _round_up(v, m):
    return ((v + m - 1) // m) * m


def _vmem_budgets():
    """Returns (vmem_limit_bytes, per-tile x byte budget), chip-aware."""
    vmem_cap = 64 * 1024 * 1024                       # conservative default (v7x)
    try:
        info = pltpu.get_tpu_info()
        vmem_cap = int(getattr(info, "vmem_capacity_bytes", vmem_cap))
    except Exception:
        pass
    # ~3/4 of physical VMEM: 48 MiB on v7x, 96 MiB on v5e/v6e.  Always set it
    # explicitly (v5e's scoped default is only 16 MiB).
    vmem_limit = min((vmem_cap * 3) // 4, 100 * 1024 * 1024)
    # x is double-buffered -> keep the two in-flight tiles <= ~2/3 of the limit,
    # leaving headroom for the weight slab, output rows and compiler scratch.
    tile_budget = min(vmem_limit // 3, 32 * 1024 * 1024)
    return vmem_limit, tile_budget


_MIN_TILE_BYTES = 2 * 1024 * 1024    # never shrink tiles below ~2 MiB
_MIN_GRID_STEPS = 4                  # keep both v7x TensorCores fed


def _pick_block_b(B, row_bytes, tile_budget):
    # Single grid step when the whole batch fits the per-tile byte budget.
    b_all = _round_up(B, 128)
    if b_all * row_bytes <= tile_budget:
        return b_all
    # Otherwise size the tile by bytes (lane-aligned, >= 128 rows).
    rows = max(128, ((tile_budget // row_bytes) // 128) * 128)
    # Soft rule: keep >= _MIN_GRID_STEPS steps (v7x megacore split) as long as
    # tiles stay >= _MIN_TILE_BYTES.
    if pl.cdiv(B, rows) < _MIN_GRID_STEPS:
        alt = max(128, _round_up(pl.cdiv(B, _MIN_GRID_STEPS), 128))
        if alt * row_bytes >= _MIN_TILE_BYTES:
            rows = min(rows, alt)
    return rows


def critic_head(x, weight, bias, *, block_b=None):
    """Forward pass of CriticHead: y = x @ weight.T + bias.

    Args:
      x:      [..., D] float array (f32 or bf16; bf16 streams at ~2x bandwidth).
      weight: [1, D]   float array (PyTorch nn.Linear weight layout).
      bias:   [1]      float array.
    Returns:
      [..., 1] array in x.dtype.
    """
    *lead, D = x.shape
    assert weight.shape == (1, D)
    assert bias.shape == (1,)

    x2 = x.reshape(-1, D)
    B = x2.shape[0]
    w_row = weight[0].astype(x.dtype)

    # Zero-pad D to a lane multiple only when unaligned so lane padding can
    # never contaminate the contraction (extra HBM pass only in that case).
    if D % 128 != 0:
        Dp = _round_up(D, 128)
        x2 = jnp.pad(x2, ((0, 0), (0, Dp - D)))
        w_row = jnp.pad(w_row, (0, Dp - D))
        D = Dp

    itemsize = jnp.dtype(x.dtype).itemsize
    vmem_limit, tile_budget = _vmem_budgets()
    if block_b is None:
        block_b = _pick_block_b(B, D * itemsize, tile_budget)
    else:
        block_b = max(128, _round_up(block_b, 128))

    grid_len = pl.cdiv(B, block_b)          # no batch padding of x
    B_out = grid_len * block_b              # lane-dense output slab, unmasked stores

    # Lane-dense operands.
    w8 = jnp.zeros((8, D), dtype=x.dtype).at[0, :].set(w_row)
    b11 = bias.reshape(1, 1).astype(jnp.float32)

    out = pl.pallas_call(
        _critic_head_kernel,
        out_shape=jax.ShapeDtypeStruct((1, B_out), x.dtype),
        grid_spec=pltpu.PrefetchScalarGridSpec(
            num_scalar_prefetch=0,
            grid=(grid_len,),
            in_specs=[
                # Streamed x tile; the ragged last block over-reads HBM rows
                # past B — those output lanes never reach the returned slice.
                pl.BlockSpec((block_b, D), lambda i: (i, 0)),
                # Resident lane-dense weight slab (constant block index; tiny).
                pl.BlockSpec((8, D), lambda i: (0, 0)),
                # Bias scalar on the scalar path.
                pl.BlockSpec(memory_space=pltpu.MemorySpace.SMEM),
            ],
            out_specs=pl.BlockSpec((1, block_b), lambda i: (0, i)),
        ),
        compiler_params=pltpu.CompilerParams(
            dimension_semantics=("parallel",),   # batch tiles split across v7x TCs
            vmem_limit_bytes=int(vmem_limit),
        ),
    )(x2, w8, b11)

    # (1, B_out) -> (..., 1), dropping over-read lanes; row order preserved.
    return out[0, :B].reshape(*lead, 1)


def init_critic_head_params(key, input_size, dtype=jnp.float32):
    """Matches the PyTorch module init: orthogonal_ on a (1, input_size) weight
    == a unit-norm random row vector; bias = 0."""
    w = jax.random.normal(key, (1, input_size), dtype=jnp.float32)
    w = w / jnp.linalg.norm(w)
    b = jnp.zeros((1,), dtype=jnp.float32)
    return w.astype(dtype), b.astype(dtype)


if __name__ == "__main__":
    key = jax.random.PRNGKey(0)
    k_x, k_w = jax.random.split(key)

    B, D = 256, 512                      # small shapes: batch=256, hidden=512
    x = jax.random.normal(k_x, (B, D), dtype=jnp.float32)
    weight, bias = init_critic_head_params(k_w, D)

    # Tiny input -> whole batch in a single grid step (512 KiB tile).
    out = jax.block_until_ready(critic_head(x, weight, bias))
    ref = x @ weight.T + bias
    assert out.shape == (B, 1)
    assert jnp.allclose(out, ref, atol=1e-4, rtol=1e-4), float(
        jnp.max(jnp.abs(out - ref)))

    # Multi-step path with a ragged last tile (no jnp.pad of x): 300 rows,
    # forced 128-row tiles -> 3 grid steps, last block over-reads HBM.
    B2 = 300
    x2 = jax.random.normal(k_x, (B2, D), dtype=jnp.float32)
    out2 = jax.block_until_ready(critic_head(x2, weight, bias, block_b=128))
    ref2 = x2 @ weight.T + bias
    assert out2.shape == (B2, 1)
    assert jnp.allclose(out2, ref2, atol=1e-4, rtol=1e-4)

    # bf16 streaming (caller-provided dtype): ~2x effective HBM bandwidth,
    # f32 MXU accumulation in-kernel.
    out_bf = jax.block_until_ready(
        critic_head(x.astype(jnp.bfloat16), weight.astype(jnp.bfloat16), bias))
    assert jnp.allclose(out_bf.astype(jnp.float32), ref, atol=5e-2, rtol=5e-2)

    print("KERNEL_OK")
</pallas_src>

<mosaic_0001>
module attributes {stable_mosaic.version = 11 : i64} {
  func.func @_critic_head_kernel(%arg0: i32, %arg1: memref<256x512xf32, #tpu.memory_space<vmem>>, %arg2: memref<8x512xf32, #tpu.memory_space<vmem>>, %arg3: memref<1x1xf32, #tpu.memory_space<smem>>, %arg4: memref<1x256xf32, #tpu.memory_space<vmem>>) attributes {dimension_semantics = [#tpu.dimension_semantics<parallel>], iteration_bounds = array<i64: 1>, scalar_prefetch = 0 : i64, scratch_operands = 0 : i64, tpu.core_type = #tpu.core_type<tc>, window_params = [{transform_indices = @transform_0, window_bounds = array<i64: 256, 512>}, {pipeline_mode = #tpu.pipeline_mode<synchronous>, transform_indices = @transform_1, window_bounds = array<i64: 8, 512>}, {transform_indices = @transform_2, window_bounds = array<i64: 1, 1>}, {transform_indices = @transform_3, window_bounds = array<i64: 1, 256>}]} {
    %c0 = arith.constant 0 : index
    %c0_0 = arith.constant 0 : index
    %0 = vector.load %arg2[%c0, %c0_0] : memref<8x512xf32, #tpu.memory_space<vmem>>, vector<8x512xf32>
    %c0_1 = arith.constant 0 : index
    %c0_2 = arith.constant 0 : index
    %1 = vector.load %arg1[%c0_1, %c0_2] : memref<256x512xf32, #tpu.memory_space<vmem>>, vector<256x512xf32>
    %cst = arith.constant dense<0.000000e+00> : vector<8x256xf32>
    %2 = tpu.matmul %0, %1, %cst {dimension_numbers = #tpu.dot_dimension_numbers<[1], [1], [0], [0], [0, 0, 1, 0], [], []>} : vector<8x512xf32>, vector<256x512xf32>, vector<8x256xf32> -> vector<8x256xf32>
    %3 = vector.extract_strided_slice %2 {offsets = [0, 0], sizes = [1, 256], strides = [1, 1]} : vector<8x256xf32> to vector<1x256xf32>
    %c0_3 = arith.constant 0 : index
    %c0_4 = arith.constant 0 : index
    %4 = memref.load %arg3[%c0_3, %c0_4] : memref<1x1xf32, #tpu.memory_space<smem>>
    %5 = vector.broadcast %4 : f32 to vector<1x256xf32>
    %6 = arith.addf %3, %5 : vector<1x256xf32>
    %c0_5 = arith.constant 0 : index
    %c0_6 = arith.constant 0 : index
    %7 = vector.load %arg4[%c0_5, %c0_6] : memref<1x256xf32, #tpu.memory_space<vmem>>, vector<1x256xf32>
    tpu.vector_store %arg4[%c0_5, %c0_6], %6 {strides = array<i32>} : memref<1x256xf32, #tpu.memory_space<vmem>>, vector<1x256xf32>,
    return
  }
  func.func @transform_0(%arg0: i32) -> (i32, i32) {
    %c0_i32 = arith.constant 0 : i32
    %c0_i32_0 = arith.constant 0 : i32
    return %arg0, %c0_i32 : i32, i32
  }
  func.func @transform_1(%arg0: i32) -> (i32, i32) {
    %c0_i32 = arith.constant 0 : i32
    %c0_i32_0 = arith.constant 0 : i32
    %c0_i32_1 = arith.constant 0 : i32
    return %c0_i32, %c0_i32_0 : i32, i32
  }
  func.func @transform_2(%arg0: i32) -> (i32, i32) {
    %c0_i32 = arith.constant 0 : i32
    %c0_i32_0 = arith.constant 0 : i32
    %c0_i32_1 = arith.constant 0 : i32
    return %c0_i32, %c0_i32_0 : i32, i32
  }
  func.func @transform_3(%arg0: i32) -> (i32, i32) {
    %c0_i32 = arith.constant 0 : i32
    %c0_i32_0 = arith.constant 0 : i32
    return %c0_i32, %arg0 : i32, i32
  }
}

</mosaic_0001>

<bundles_post_ra>
// kernel: tpu_custom_call.1
= control target key start
LH: loop header
LB: loop body
LE: loop exit
PB: predicated region body
PF: predicated region fallthrough
CT: control target
= control target key end

     0   :  { %9 = vsyncpa [#allocation4], 0  ;;  %s469_s0 = inlined_call_operand.hbm [shape: f32[256,512], index: 0, kind: input, shape index: {}]   ;;  %s470_s1 = inlined_call_operand.hbm [shape: f32[8,512], index: 1, kind: input, shape index: {}]   ;;  %s471_s2 = inlined_call_operand.<no memory space> [shape: f32[1,1], index: 2, kind: input, shape index: {}]   ;;  %s472_s3 = inlined_call_operand.hbm [shape: f32[1,256], index: 3, kind: output, shape index: {}]  }
   0x1   :  { %10 = vsyncpa [#allocation7], 0 }
   0x2   :  { %11 = vsyncpa [#allocation5], 0  ;;  %s431_s12 = smov [#allocation3]  }
   0x3   :  { %s17_s13 = sshll.u32 %s431_s12, 4  ;;  %s18_s13 = int_to_ptr.vmem [resolvable:$true] %s17_s13 }
   0x4   :  { %s373_s14 = scalar_lea.vmem %s18_s13, 16384  ;;  %p378_p1 = scmp.lt.s32.totalorder %s18_s13, %s18_s13 }
   0x5   :  { %p374_p0 = scmp.ne.s32.totalorder %s18_s13, %s373_s14  ;;  %p379_p2 = scmp.lt.s32.totalorder %s373_s14, %s373_s14 }
   0x7   :  { %p380_p3 = por %p379_p2, %p378_p1 }
   0x9   :  { %p381_p4 = pnand %p380_p3, %p374_p0 }
   0xb   :  { %384 = shalt.err (!%p381_p4)
}
   0xc   :  { %s432_s15 = smov 512   ;;  %s433_s16 = smov 32  }
   0xd   :  { %23 = dma.hbm_to_vmem [thread:$0]  %s469_s0, 16384, %s18_s13, [#allocation4], %s432_s15, %s432_s15, %s433_s16  }
   0xe   :  { %s434_s19 = smov [#allocation6]  }
   0xf   :  { %s30_s20 = sshll.u32 %s434_s19, 4  ;;  %s31_s20 = int_to_ptr.vmem [resolvable:$true] %s30_s20 }
  0x10   :  { %s393_s21 = scalar_lea.vmem %s31_s20, 512  ;;  %p398_p6 = scmp.lt.s32.totalorder %s31_s20, %s31_s20 }
  0x11   :  { %p394_p5 = scmp.ne.s32.totalorder %s31_s20, %s393_s21  ;;  %p399_p7 = scmp.lt.s32.totalorder %s393_s21, %s393_s21 }
  0x13   :  { %p400_p8 = por %p399_p7, %p398_p6 }
  0x15   :  { %p401_p9 = pnand %p400_p8, %p394_p5 }
  0x17   :  { %404 = shalt.err (!%p401_p9)
}
  0x18   :  { %33 = dma.hbm_to_vmem [thread:$0]  %s470_s1, 512, %s31_s20, [#allocation7]  }
  0x19   :  { %425 = dma.done.wait [#allocation4], 16384  }
  0x1a   :  { %426 = vsyncadd [#allocation4], 4294950912 }
  0x1b   :  { %427 = dma.done.wait [#allocation7], 512  }
  0x1c   :  { %428 = vsyncadd [#allocation7], 4294966784  ;;  %v107_v0 = vld [vmem:[#allocation3 + $0x1e8] sm:$0xff]  ;;  %v109_v1 = vld [vmem:[#allocation3 + $0x1f8] sm:$0xff]  ;;  %s436_s24 = smov [#allocation8]  }
  0x1d   :  { %v106_v2 = vld [vmem:[#allocation3 + $0x1e0] sm:$0xff]  ;;  %174 = vmatprep.subr.mxu0 %v107_v0  ;;  %245 = vmatprep.subr.mxu1 %v109_v1  ;;  %v108_v3 = vld [vmem:[#allocation3 + $0x1f0] sm:$0xff]  ;;  %v103_v4 = vld [vmem:[#allocation3 + $0x1c8] sm:$0xff]  ;;  %s349_s25 = sshll.u32 %s436_s24, 4  ;;  %s350_s25 = int_to_ptr.vmem [resolvable:$true] %s349_s25 }
  0x1e   :  { %v105_v5 = vld [vmem:[#allocation3 + $0x1d8] sm:$0xff]  ;;  %175 = vmatpush1.xpose.msra.mxu0 %v106_v2  ;;  %246 = vmatpush1.xpose.msra.mxu1 %v108_v3  ;;  %v102_v6 = vld [vmem:[#allocation3 + $0x1c0] sm:$0xff]  ;;  %v104_v7 = vld [vmem:[#allocation3 + $0x1d0] sm:$0xff]  ;;  %s405_s26 = scalar_lea.vmem %s350_s25, 32  ;;  %p410_p11 = scmp.lt.s32.totalorder %s350_s25, %s350_s25 }
  0x1f   :  { %176 = vmatprep.subr.mxu0 %v103_v4  ;;  %247 = vmatprep.subr.mxu1 %v105_v5  ;;  %v99_v8 = vld [vmem:[#allocation3 + $0x1a8] sm:$0xff]  ;;  %v101_v9 = vld [vmem:[#allocation3 + $0x1b8] sm:$0xff]  ;;  %v98_v10 = vld [vmem:[#allocation3 + $0x1a0] sm:$0xff]  ;;  %p406_p10 = scmp.ne.s32.totalorder %s350_s25, %s405_s26  ;;  %p411_p12 = scmp.lt.s32.totalorder %s405_s26, %s405_s26 }
  0x20   :  { %v100_v11 = vld [vmem:[#allocation3 + $0x1b0] sm:$0xff]  ;;  %v95_v12 = vld [vmem:[#allocation3 + $0x188] sm:$0xff]  ;;  %v97_v13 = vld [vmem:[#allocation3 + $0x198] sm:$0xff] }
  0x21   :  { %v94_v14 = vld [vmem:[#allocation3 + $0x180] sm:$0xff]  ;;  %v96_v15 = vld [vmem:[#allocation3 + $0x190] sm:$0xff]  ;;  %v91_v16 = vld [vmem:[#allocation3 + $0x168] sm:$0xff]  ;;  %p412_p13 = por %p411_p12, %p410_p11 }
  0x22   :  { %177 = vmatpush1.xpose.msra.mxu0 %v102_v6  ;;  %248 = vmatpush1.xpose.msra.mxu1 %v104_v7  ;;  %v93_v17 = vld [vmem:[#allocation3 + $0x178] sm:$0xff]  ;;  %v90_v18 = vld [vmem:[#allocation3 + $0x160] sm:$0xff]  ;;  %v92_v19 = vld [vmem:[#allocation3 + $0x170] sm:$0xff] }
  0x23   :  { %178 = vmatprep.subr.mxu0 %v99_v8  ;;  %249 = vmatprep.subr.mxu1 %v101_v9  ;;  %v87_v20 = vld [vmem:[#allocation3 + $0x148] sm:$0xff]  ;;  %v89_v21 = vld [vmem:[#allocation3 + $0x158] sm:$0xff]  ;;  %v86_v22 = vld [vmem:[#allocation3 + $0x140] sm:$0xff]  ;;  %p413_p0 = pnand %p412_p13, %p406_p10 }
  0x24   :  { %v88_v23 = vld [vmem:[#allocation3 + $0x150] sm:$0xff]  ;;  %v83_v24 = vld [vmem:[#allocation3 + $0x128] sm:$0xff]  ;;  %v85_v25 = vld [vmem:[#allocation3 + $0x138] sm:$0xff] }
  0x25   :  { %v82_v26 = vld [vmem:[#allocation3 + $0x120] sm:$0xff]  ;;  %v84_v27 = vld [vmem:[#allocation3 + $0x130] sm:$0xff]  ;;  %v79_v28 = vld [vmem:[#allocation3 + $0x108] sm:$0xff] }
  0x26   :  { %179 = vmatpush1.xpose.msra.mxu0 %v98_v10  ;;  %250 = vmatpush1.xpose.msra.mxu1 %v100_v11  ;;  %v81_v29 = vld [vmem:[#allocation3 + $0x118] sm:$0xff]  ;;  %v78_v30 = vld [vmem:[#allocation3 + $0x100] sm:$0xff]  ;;  %v80_v31 = vld [vmem:[#allocation3 + $0x110] sm:$0xff] }
  0x27   :  { %180 = vmatprep.subr.mxu0 %v95_v12  ;;  %251 = vmatprep.subr.mxu1 %v97_v13  ;;  %v75_v32 = vld [vmem:[#allocation3 + $0xe8] sm:$0xff]  ;;  %v77_v33 = vld [vmem:[#allocation3 + $0xf8] sm:$0xff]  ;;  %v74_v34 = vld [vmem:[#allocation3 + $0xe0] sm:$0xff] }
  0x28   :  { %v76_v35 = vld [vmem:[#allocation3 + $0xf0] sm:$0xff]  ;;  %v71_v36 = vld [vmem:[#allocation3 + $0xc8] sm:$0xff]  ;;  %v73_v37 = vld [vmem:[#allocation3 + $0xd8] sm:$0xff] }
  0x29   :  { %v70_v38 = vld [vmem:[#allocation3 + $0xc0] sm:$0xff]  ;;  %v72_v39 = vld [vmem:[#allocation3 + $0xd0] sm:$0xff]  ;;  %v67_v40 = vld [vmem:[#allocation3 + $0xa8] sm:$0xff] }
  0x2a   :  { %181 = vmatpush1.xpose.msra.mxu0 %v94_v14  ;;  %252 = vmatpush1.xpose.msra.mxu1 %v96_v15  ;;  %v69_v41 = vld [vmem:[#allocation3 + $0xb8] sm:$0xff]  ;;  %v66_v42 = vld [vmem:[#allocation3 + $0xa0] sm:$0xff]  ;;  %v68_v43 = vld [vmem:[#allocation3 + $0xb0] sm:$0xff] }
  0x2b   :  { %182 = vmatprep.subr.mxu0 %v91_v16  ;;  %253 = vmatprep.subr.mxu1 %v93_v17  ;;  %v63_v44 = vld [vmem:[#allocation3 + $0x88] sm:$0xff]  ;;  %v65_v45 = vld [vmem:[#allocation3 + $0x98] sm:$0xff]  ;;  %v62_v47 = vld [vmem:[#allocation3 + $0x80] sm:$0xff] }
  0x2c   :  { %v43_v46 = vld [vmem:[#allocation6 + $0x8] sm:$0xff]  ;;  %v64_v48 = vld [vmem:[#allocation3 + $0x90] sm:$0xff]  ;;  %v45_v49 = vld [vmem:[#allocation6 + $0x18] sm:$0xff] }
  0x2d   :  { %v59_v50 = vld [vmem:[#allocation3 + $0x68] sm:$0xff]  ;;  %v61_v51 = vld [vmem:[#allocation3 + $0x78] sm:$0xff]  ;;  %238 = vmatprep.mubr.f32.mxu0 %v43_v46  ;;  %309 = vmatprep.mubr.f32.mxu1 %v45_v49  ;;  %v58_v52 = vld [vmem:[#allocation3 + $0x60] sm:$0xff] }
  0x2e   :  { %183 = vmatpush1.xpose.msra.mxu0 %v90_v18  ;;  %254 = vmatpush1.xpose.msra.mxu1 %v92_v19  ;;  %v60_v53 = vld [vmem:[#allocation3 + $0x70] sm:$0xff]  ;;  %v55_v54 = vld [vmem:[#allocation3 + $0x48] sm:$0xff]  ;;  %v57_v55 = vld [vmem:[#allocation3 + $0x58] sm:$0xff] }
  0x2f   :  { %184 = vmatprep.subr.mxu0 %v87_v20  ;;  %255 = vmatprep.subr.mxu1 %v89_v21  ;;  %v54_v56 = vld [vmem:[#allocation3 + $0x40] sm:$0xff]  ;;  %v56_v57 = vld [vmem:[#allocation3 + $0x50] sm:$0xff]  ;;  %v51_v58 = vld [vmem:[#allocation3 + $0x28] sm:$0xff] }
  0x30   :  { %v53_v59 = vld [vmem:[#allocation3 + $0x38] sm:$0xff]  ;;  %v50_v60 = vld [vmem:[#allocation3 + $0x20] sm:$0xff]  ;;  %v52_v61 = vld [vmem:[#allocation3 + $0x30] sm:$0xff] }
  0x31   :  { %v47_v62 = vld [vmem:[#allocation3 + $0x8] sm:$0xff]  ;;  %v49_v63 = vld [vmem:[#allocation3 + $0x18] sm:$0xff]  ;;  %v46_v0 = vld [vmem:[#allocation3] sm:$0xff] }
  0x32   :  { %185 = vmatpush1.xpose.msra.mxu0 %v86_v22  ;;  %256 = vmatpush1.xpose.msra.mxu1 %v88_v23  ;;  %v48_v1 = vld [vmem:[#allocation3 + $0x10] sm:$0xff]  ;;  %v171_v2 = vld [vmem:[#allocation3 + $0x3e8] sm:$0xff]  ;;  %v173_v3 = vld [vmem:[#allocation3 + $0x3f8] sm:$0xff] }
  0x33   :  { %186 = vmatprep.subr.mxu0 %v83_v24  ;;  %257 = vmatprep.subr.mxu1 %v85_v25  ;;  %v170_v4 = vld [vmem:[#allocation3 + $0x3e0] sm:$0xff]  ;;  %v172_v5 = vld [vmem:[#allocation3 + $0x3f0] sm:$0xff]  ;;  %v167_v6 = vld [vmem:[#allocation3 + $0x3c8] sm:$0xff] }
  0x34   :  { %v169_v7 = vld [vmem:[#allocation3 + $0x3d8] sm:$0xff]  ;;  %v166_v8 = vld [vmem:[#allocation3 + $0x3c0] sm:$0xff]  ;;  %v168_v9 = vld [vmem:[#allocation3 + $0x3d0] sm:$0xff] }
  0x35   :  { %v163_v10 = vld [vmem:[#allocation3 + $0x3a8] sm:$0xff]  ;;  %v165_v11 = vld [vmem:[#allocation3 + $0x3b8] sm:$0xff]  ;;  %v162_v12 = vld [vmem:[#allocation3 + $0x3a0] sm:$0xff] }
  0x36   :  { %187 = vmatpush1.xpose.msra.mxu0 %v82_v26  ;;  %258 = vmatpush1.xpose.msra.mxu1 %v84_v27  ;;  %v164_v13 = vld [vmem:[#allocation3 + $0x3b0] sm:$0xff]  ;;  %v159_v14 = vld [vmem:[#allocation3 + $0x388] sm:$0xff]  ;;  %v161_v15 = vld [vmem:[#allocation3 + $0x398] sm:$0xff] }
  0x37   :  { %188 = vmatprep.subr.mxu0 %v79_v28  ;;  %259 = vmatprep.subr.mxu1 %v81_v29  ;;  %v158_v16 = vld [vmem:[#allocation3 + $0x380] sm:$0xff]  ;;  %v160_v17 = vld [vmem:[#allocation3 + $0x390] sm:$0xff]  ;;  %v155_v18 = vld [vmem:[#allocation3 + $0x368] sm:$0xff] }
  0x38   :  { %v157_v19 = vld [vmem:[#allocation3 + $0x378] sm:$0xff]  ;;  %v154_v20 = vld [vmem:[#allocation3 + $0x360] sm:$0xff]  ;;  %v156_v21 = vld [vmem:[#allocation3 + $0x370] sm:$0xff] }
  0x39   :  { %v151_v22 = vld [vmem:[#allocation3 + $0x348] sm:$0xff]  ;;  %v153_v23 = vld [vmem:[#allocation3 + $0x358] sm:$0xff]  ;;  %v150_v24 = vld [vmem:[#allocation3 + $0x340] sm:$0xff] }
  0x3a   :  { %189 = vmatpush1.xpose.msra.mxu0 %v78_v30  ;;  %260 = vmatpush1.xpose.msra.mxu1 %v80_v31  ;;  %v152_v25 = vld [vmem:[#allocation3 + $0x350] sm:$0xff]  ;;  %v147_v26 = vld [vmem:[#allocation3 + $0x328] sm:$0xff]  ;;  %v149_v27 = vld [vmem:[#allocation3 + $0x338] sm:$0xff] }
  0x3b   :  { %190 = vmatprep.subr.mxu0 %v75_v32  ;;  %261 = vmatprep.subr.mxu1 %v77_v33  ;;  %v146_v28 = vld [vmem:[#allocation3 + $0x320] sm:$0xff]  ;;  %v148_v29 = vld [vmem:[#allocation3 + $0x330] sm:$0xff]  ;;  %v143_v30 = vld [vmem:[#allocation3 + $0x308] sm:$0xff] }
  0x3c   :  { %v145_v31 = vld [vmem:[#allocation3 + $0x318] sm:$0xff]  ;;  %v142_v32 = vld [vmem:[#allocation3 + $0x300] sm:$0xff]  ;;  %v144_v33 = vld [vmem:[#allocation3 + $0x310] sm:$0xff] }
  0x3d   :  { %v127_v46 = vld [vmem:[#allocation3 + $0x288] sm:$0xff]  ;;  %v128_v49 = vld [vmem:[#allocation3 + $0x290] sm:$0xff] }
  0x3e   :  { %191 = vmatpush1.xpose.msra.mxu0 %v74_v34  ;;  %262 = vmatpush1.xpose.msra.mxu1 %v76_v35  ;;  %v139_v34 = vld [vmem:[#allocation3 + $0x2e8] sm:$0xff]  ;;  %v141_v35 = vld [vmem:[#allocation3 + $0x2f8] sm:$0xff] }
  0x3f   :  { %192 = vmatprep.subr.mxu0 %v71_v36  ;;  %263 = vmatprep.subr.mxu1 %v73_v37  ;;  %v138_v36 = vld [vmem:[#allocation3 + $0x2e0] sm:$0xff]  ;;  %v140_v37 = vld [vmem:[#allocation3 + $0x2f0] sm:$0xff] }
  0x42   :  { %193 = vmatpush1.xpose.msra.mxu0 %v70_v38  ;;  %264 = vmatpush1.xpose.msra.mxu1 %v72_v39  ;;  %v135_v38 = vld [vmem:[#allocation3 + $0x2c8] sm:$0xff]  ;;  %v137_v39 = vld [vmem:[#allocation3 + $0x2d8] sm:$0xff] }
  0x43   :  { %194 = vmatprep.subr.mxu0 %v67_v40  ;;  %265 = vmatprep.subr.mxu1 %v69_v41  ;;  %v134_v40 = vld [vmem:[#allocation3 + $0x2c0] sm:$0xff]  ;;  %v136_v41 = vld [vmem:[#allocation3 + $0x2d0] sm:$0xff] }
  0x46   :  { %195 = vmatpush1.xpose.msra.mxu0 %v66_v42  ;;  %266 = vmatpush1.xpose.msra.mxu1 %v68_v43  ;;  %v131_v42 = vld [vmem:[#allocation3 + $0x2a8] sm:$0xff]  ;;  %v133_v43 = vld [vmem:[#allocation3 + $0x2b8] sm:$0xff] }
  0x47   :  { %196 = vmatprep.subr.mxu0 %v63_v44  ;;  %267 = vmatprep.subr.mxu1 %v65_v45  ;;  %v130_v44 = vld [vmem:[#allocation3 + $0x2a0] sm:$0xff]  ;;  %v132_v45 = vld [vmem:[#allocation3 + $0x2b0] sm:$0xff] }
  0x4a   :  { %197 = vmatpush1.xpose.msra.mxu0 %v62_v47  ;;  %268 = vmatpush1.xpose.msra.mxu1 %v64_v48  ;;  %v129_v47 = vld [vmem:[#allocation3 + $0x298] sm:$0xff]  ;;  %v126_v48 = vld [vmem:[#allocation3 + $0x280] sm:$0xff] }
  0x4b   :  { %198 = vmatprep.subr.mxu0 %v59_v50  ;;  %269 = vmatprep.subr.mxu1 %v61_v51  ;;  %v123_v50 = vld [vmem:[#allocation3 + $0x268] sm:$0xff]  ;;  %v125_v51 = vld [vmem:[#allocation3 + $0x278] sm:$0xff] }
  0x4e   :  { %199 = vmatpush1.xpose.msra.mxu0 %v58_v52  ;;  %270 = vmatpush1.xpose.msra.mxu1 %v60_v53  ;;  %v122_v52 = vld [vmem:[#allocation3 + $0x260] sm:$0xff]  ;;  %v124_v53 = vld [vmem:[#allocation3 + $0x270] sm:$0xff] }
  0x4f   :  { %200 = vmatprep.subr.mxu0 %v55_v54  ;;  %271 = vmatprep.subr.mxu1 %v57_v55  ;;  %v119_v54 = vld [vmem:[#allocation3 + $0x248] sm:$0xff]  ;;  %v121_v55 = vld [vmem:[#allocation3 + $0x258] sm:$0xff] }
  0x52   :  { %201 = vmatpush1.xpose.msra.mxu0 %v54_v56  ;;  %272 = vmatpush1.xpose.msra.mxu1 %v56_v57  ;;  %v118_v56 = vld [vmem:[#allocation3 + $0x240] sm:$0xff]  ;;  %v120_v57 = vld [vmem:[#allocation3 + $0x250] sm:$0xff] }
  0x53   :  { %202 = vmatprep.subr.mxu0 %v51_v58  ;;  %273 = vmatprep.subr.mxu1 %v53_v59  ;;  %v115_v58 = vld [vmem:[#allocation3 + $0x228] sm:$0xff]  ;;  %v117_v59 = vld [vmem:[#allocation3 + $0x238] sm:$0xff] }
  0x56   :  { %203 = vmatpush1.xpose.msra.mxu0 %v50_v60  ;;  %274 = vmatpush1.xpose.msra.mxu1 %v52_v61  ;;  %v114_v60 = vld [vmem:[#allocation3 + $0x220] sm:$0xff]  ;;  %v116_v61 = vld [vmem:[#allocation3 + $0x230] sm:$0xff] }
  0x57   :  { %204 = vmatprep.subr.mxu0 %v47_v62  ;;  %275 = vmatprep.subr.mxu1 %v49_v63  ;;  %v111_v62 = vld [vmem:[#allocation3 + $0x208] sm:$0xff]  ;;  %v113_v63 = vld [vmem:[#allocation3 + $0x218] sm:$0xff] }
  0x5a   :  { %205 = vmatpush1.xpose.msra.mxu0 %v46_v0  ;;  %276 = vmatpush1.xpose.msra.mxu1 %v48_v1  ;;  %v110_v0 = vld [vmem:[#allocation3 + $0x200] sm:$0xff]  ;;  %v112_v1 = vld [vmem:[#allocation3 + $0x210] sm:$0xff] }
  0x5b   :  { %206 = vmatprep.subr.mxu0 %v171_v2  ;;  %277 = vmatprep.subr.mxu1 %v173_v3  ;;  %v42_v2 = vld [vmem:[#allocation6] sm:$0xff]  ;;  %v44_v3 = vld [vmem:[#allocation6 + $0x10] sm:$0xff] }
  0x5e   :  { %207 = vmatpush2.xpose.msra.mxu0 %v170_v4  ;;  %278 = vmatpush2.xpose.msra.mxu1 %v172_v5  ;;  %v435_v4 = vmov 1966171168  }
  0x5f   :  { %208 = vmatprep.subr.mxu0 %v167_v6  ;;  %279 = vmatprep.subr.mxu1 %v169_v7  ;;  %v324_v5 = vunpack.c.l.s4 %v435_v4  ;;  %v326_v6 = vlaneseq }
  0x61   :  { %vm340_vm0 = vcmp.lt.s32.totalorder %v326_v6, 256 }
  0x62   :  { %209 = vmatpush2.xpose.msra.mxu0 %v166_v8  ;;  %280 = vmatpush2.xpose.msra.mxu1 %v168_v9 }
  0x63   :  { %210 = vmatprep.subr.mxu0 %v163_v10  ;;  %281 = vmatprep.subr.mxu1 %v165_v11  ;;  %v325_v10 = vunpack.c.0.s8 %v324_v5  ;;  %v327_v11 = vshrl.u32 %v326_v6, 7 }
  0x66   :  { %211 = vmatpush2.xpose.msra.mxu0 %v162_v12  ;;  %282 = vmatpush2.xpose.msra.mxu1 %v164_v13  ;;  %v317_v12 = vstv %s471_s2 }
  0x67   :  { %212 = vmatprep.subr.mxu0 %v159_v14  ;;  %283 = vmatprep.subr.mxu1 %v161_v15 }
  0x6a   :  { %213 = vmatpush2.xpose.msra.mxu0 %v158_v16  ;;  %284 = vmatpush2.xpose.msra.mxu1 %v160_v17 }
  0x6b   :  { %214 = vmatprep.subr.mxu0 %v155_v18  ;;  %285 = vmatprep.subr.mxu1 %v157_v19  ;;  %v328_v18 = vsub.s32 %v325_v10, %v327_v11 }
  0x6e   :  { %215 = vmatpush2.xpose.msra.mxu0 %v154_v20  ;;  %286 = vmatpush2.xpose.msra.mxu1 %v156_v21 }
  0x6f   :  { %216 = vmatprep.subr.mxu0 %v151_v22  ;;  %287 = vmatprep.subr.mxu1 %v153_v23 }
  0x72   :  { %217 = vmatpush2.xpose.msra.mxu0 %v150_v24  ;;  %288 = vmatpush2.xpose.msra.mxu1 %v152_v25 }
  0x73   :  { %218 = vmatprep.subr.mxu0 %v147_v26  ;;  %289 = vmatprep.subr.mxu1 %v149_v27 }
  0x76   :  { %219 = vmatpush2.xpose.msra.mxu0 %v146_v28  ;;  %290 = vmatpush2.xpose.msra.mxu1 %v148_v29 }
  0x77   :  { %220 = vmatprep.subr.mxu0 %v143_v30  ;;  %291 = vmatprep.subr.mxu1 %v145_v31 }
  0x7a   :  { %221 = vmatpush2.xpose.msra.mxu0 %v142_v32  ;;  %292 = vmatpush2.xpose.msra.mxu1 %v144_v33 }
  0x7b   :  { %222 = vmatprep.subr.mxu0 %v139_v34  ;;  %293 = vmatprep.subr.mxu1 %v141_v35 }
  0x7e   :  { %223 = vmatpush2.xpose.msra.mxu0 %v138_v36  ;;  %294 = vmatpush2.xpose.msra.mxu1 %v140_v37 }
  0x7f   :  { %224 = vmatprep.subr.mxu0 %v135_v38  ;;  %295 = vmatprep.subr.mxu1 %v137_v39 }
  0x82   :  { %225 = vmatpush2.xpose.msra.mxu0 %v134_v40  ;;  %296 = vmatpush2.xpose.msra.mxu1 %v136_v41 }
  0x83   :  { %226 = vmatprep.subr.mxu0 %v131_v42  ;;  %297 = vmatprep.subr.mxu1 %v133_v43 }
  0x86   :  { %227 = vmatpush2.xpose.msra.mxu0 %v130_v44  ;;  %298 = vmatpush2.xpose.msra.mxu1 %v132_v45 }
  0x87   :  { %228 = vmatprep.subr.mxu0 %v127_v46  ;;  %299 = vmatprep.subr.mxu1 %v129_v47 }
  0x8a   :  { %229 = vmatpush2.xpose.msra.mxu0 %v126_v48  ;;  %300 = vmatpush2.xpose.msra.mxu1 %v128_v49 }
  0x8b   :  { %230 = vmatprep.subr.mxu0 %v123_v50  ;;  %301 = vmatprep.subr.mxu1 %v125_v51 }
  0x8e   :  { %231 = vmatpush2.xpose.msra.mxu0 %v122_v52  ;;  %302 = vmatpush2.xpose.msra.mxu1 %v124_v53 }
  0x8f   :  { %232 = vmatprep.subr.mxu0 %v119_v54  ;;  %303 = vmatprep.subr.mxu1 %v121_v55 }
  0x92   :  { %233 = vmatpush2.xpose.msra.mxu0 %v118_v56  ;;  %304 = vmatpush2.xpose.msra.mxu1 %v120_v57 }
  0x93   :  { %234 = vmatprep.subr.mxu0 %v115_v58  ;;  %305 = vmatprep.subr.mxu1 %v117_v59 }
  0x96   :  { %235 = vmatpush2.xpose.msra.mxu0 %v114_v60  ;;  %306 = vmatpush2.xpose.msra.mxu1 %v116_v61 }
  0x97   :  { %236 = vmatprep.subr.mxu0 %v111_v62  ;;  %307 = vmatprep.subr.mxu1 %v113_v63 }
  0x9a   :  { %237 = vmatpush2.xpose.msra.mxu0 %v110_v0  ;;  %308 = vmatpush2.xpose.msra.mxu1 %v112_v1 }
  0x9d   :  { %239 = vmatmul.mubr.f32.vlgmr.msra.gmra.mxu0 %v42_v2  ;;  %310 = vmatmul.mubr.f32.vlgmr.msra.gmra.mxu1 %v44_v3 }
 0x15d   :  { %v240_v7 = vpop.f32.mrf.mxu0  ;;  %v311_v8 = vpop.f32.mrf.mxu1 }
 0x15e   :  { %v312_v9 = vadd.f32 %v311_v8, %v240_v7 }
 0x15f   :  { %v242_v13 = vpop.f32.mrf.mxu0  ;;  %v313_v14 = vpop.f32.mrf.mxu1 }
 0x160   :  { %v314_v15 = vadd.f32 %v313_v14, %v242_v13  ;;  %v318_v16 = vadd.f32 %v317_v12, %v312_v9 }
 0x162   :  { %v319_v17 = vadd.f32 %v317_v12, %v314_v15 }
 0x164   :  { %v322_v19 = vcombine.low %v318_v16, %v319_v17 }
 0x166   :  { %v329_v20 = vrot.slane %v322_v19, %v328_v18 }
 0x168   :  { %v336_v21 = vrot.slane %v329_v20, %v328_v18 }
 0x16a   :  { %342 = vst.msk [vmem:[#allocation8] sm:$0x3] %vm340_vm0, %v336_v21 }
 0x16b   :  { %416 = shalt.err (!%p413_p0)
}
 0x16c   :  { %352 = dma.vmem_to_hbm [thread:$0]  %s350_s25, 32, %s472_s3, [#allocation5]  }
 0x16d   :  { %429 = dma.done.wait [#allocation5], 32  }
 0x16e   :  { %430 = vsyncadd [#allocation5], 4294967264 }
 0x16f   :  { %356 = vsyncpa [#allocation4], 1 }
 0x170   :  { %357 = vsyncpa [#allocation7], 1 }
 0x171   :  { %358 = vsyncpa [#allocation5], 1 }

</bundles_post_ra>
